<compile_context>
chip_gen: v6e
topology: v6e:2x2x1
jax: 0.10.0
libtpu: 0.0.40
codegen_flags: <defaults>
</compile_context>

<pallas_src>
import jax
import jax.numpy as jnp
from jax.experimental import pallas as pl
from jax.experimental.pallas import tpu as pltpu


# ---------------------------------------------------------------------------
# Packed constant slab layout: one f32 [_ADJ_R + ceil(N/8)*8, 128] array.
# Every segment starts on an 8-row (sublane-tile) boundary; every weight is
# zero-padded to the full 128 lanes so in-kernel reads never lane-slice before
# the MXU.  W2/W3/WL segments are 128 rows so the v7x MXU path can contract
# full-width intermediates against them directly.
# ---------------------------------------------------------------------------
_F_IN, _F_PAD = 34, 40          # raw / sublane-padded feature width
_SEG_ROWS = 128                 # rows per small-weight segment

_W1_R = 0                       # rows   0: 40   W1 [34,4] (rows 34:40 zero)
_W2_R = 40                      # rows  40:168   W2 [4,4]  in top-left corner
_W3_R = 168                     # rows 168:296   W3 [4,2]
_WL_R = 296                     # rows 296:424   WL [2,4]
_B1_R = 424                     # single full-lane rows, all 8-aligned
_B2_R = 432
_B3_R = 440
_BL_R = 448
_ADJ_R = 456                    # rows 456:456+N, lanes 0:N hold A_hat
_P_COLS = 128


def _small_k_on_mxu():
    """v7x's addressed MRB makes tiny dependent dots cheap; keep VPU on v5e/v6e."""
    try:
        kind = jax.devices()[0].device_kind.lower()
    except Exception:
        return False
    return ("v7" in kind) or ("7x" in kind)


_SMALL_K_ON_MXU = _small_k_on_mxu()


def _small_k_matmul(h, p_ref, row0, k):
    """[N,128] @ tiny-K weight segment, keeping the full 128-lane width.

    MXU path (v7x): one dot against the 128-row zero-padded segment.
    VPU path (v5e/v6e): unrolled broadcast-FMA; pairwise accumulation tree to
    halve the dependent-add chain.  One aligned 8-row load, rows sliced
    in-register.
    # TODO(synk): if v5e profiling shows XLU saturation, pre-splat weight rows
    # across 16 sublanes host-side so only the h-column lane-broadcast remains.
    """
    if _SMALL_K_ON_MXU:
        return jnp.dot(h, p_ref[row0:row0 + _SEG_ROWS, :],
                       preferred_element_type=jnp.float32)
    w8 = p_ref[row0:row0 + 8, :]                       # aligned 8-row load
    terms = [h[:, kk:kk + 1] * w8[kk:kk + 1, :] for kk in range(k)]
    while len(terms) > 1:                              # pairwise tree
        nxt = [terms[i] + terms[i + 1] for i in range(0, len(terms) - 1, 2)]
        if len(terms) % 2:
            nxt.append(terms[-1])
        terms = nxt
    return terms[0]


def _gcn_net_kernel(x_ref, p_ref, out_ref, x3_ref):
    n = x_ref.shape[0]
    adj = p_ref[_ADJ_R:_ADJ_R + n, 0:n]                # [N,N] A_hat (from slab)

    b1 = p_ref[_B1_R:_B1_R + 1, :]                     # full-lane bias rows
    b2 = p_ref[_B2_R:_B2_R + 1, :]
    b3 = p_ref[_B3_R:_B3_R + 1, :]
    bl = p_ref[_BL_R:_BL_R + 1, :]

    # GCNConv 1: relu(A_hat @ (X @ W1) + b1)     (K=40 -> MXU, full-lane W1 seg)
    h = jnp.dot(x_ref[...], p_ref[_W1_R:_W1_R + _F_PAD, :],
                preferred_element_type=jnp.float32)    # [N,128], lanes 4: zero
    h = jnp.dot(adj, h, preferred_element_type=jnp.float32) + b1
    h = jnp.maximum(h, 0.0)

    # GCNConv 2: relu(A_hat @ (H @ W2) + b2)
    h = _small_k_matmul(h, p_ref, _W2_R, 4)
    h = jnp.dot(adj, h, preferred_element_type=jnp.float32) + b2
    h = jnp.maximum(h, 0.0)

    # GCNConv 3: relu(A_hat @ (H @ W3) + b3)
    h = _small_k_matmul(h, p_ref, _W3_R, 4)
    h = jnp.dot(adj, h, preferred_element_type=jnp.float32) + b3
    x3 = jnp.maximum(h, 0.0)                           # [N,128], lanes 2: zero

    # Linear head.  In the PyTorch source `out.relu()` is not assigned, so the
    # returned `out` is the PRE-activation linear output.
    out = _small_k_matmul(x3, p_ref, _WL_R, 2) + bl

    # One store per output, no wrapper-side slicing after the call.
    out_ref[...] = out[:, 0:4]
    x3_ref[...] = x3[:, 0:2]


# ---------------------------------------------------------------------------
# Host-side, hoisted once-per-(graph, model) preprocessing.
# ---------------------------------------------------------------------------
def normalized_adjacency(edge_index, num_nodes):
    """Dense D^-1/2 (A + I) D^-1/2 with A[target, source] = 1 (GCNConv norm)."""
    src, dst = edge_index[0], edge_index[1]
    one_src = jax.nn.one_hot(src, num_nodes, dtype=jnp.float32)
    one_dst = jax.nn.one_hot(dst, num_nodes, dtype=jnp.float32)
    a = one_dst.T @ one_src + jnp.eye(num_nodes, dtype=jnp.float32)
    dinv = jax.lax.rsqrt(a.sum(axis=1))
    return dinv[:, None] * a * dinv[None, :]


def init_params(key):
    ks = jax.random.split(key, 8)
    return {
        "w1": 0.3 * jax.random.normal(ks[0], (34, 4), jnp.float32),
        "b1": 0.1 * jax.random.normal(ks[1], (1, 4), jnp.float32),
        "w2": 0.3 * jax.random.normal(ks[2], (4, 4), jnp.float32),
        "b2": 0.1 * jax.random.normal(ks[3], (1, 4), jnp.float32),
        "w3": 0.3 * jax.random.normal(ks[4], (4, 2), jnp.float32),
        "b3": 0.1 * jax.random.normal(ks[5], (1, 2), jnp.float32),
        # torch Linear(2, 4): weight [4, 2]; stored transposed [2, 4].
        "wl": 0.3 * jax.random.normal(ks[6], (2, 4), jnp.float32),
        "bl": 0.1 * jax.random.normal(ks[7], (1, 4), jnp.float32),
    }


def pack_params(params, adj):
    """Pack all weights/biases AND the normalized adjacency into one slab."""
    n = adj.shape[0]
    assert n <= _P_COLS, "single-block kernel supports N <= 128; tile otherwise"
    rows = _ADJ_R + ((n + 7) // 8) * 8
    slab = jnp.zeros((rows, _P_COLS), jnp.float32)
    slab = slab.at[_W1_R:_W1_R + _F_IN, 0:4].set(params["w1"])
    slab = slab.at[_W2_R:_W2_R + 4, 0:4].set(params["w2"])
    slab = slab.at[_W3_R:_W3_R + 4, 0:2].set(params["w3"])
    slab = slab.at[_WL_R:_WL_R + 2, 0:4].set(params["wl"])
    slab = slab.at[_B1_R, 0:4].set(params["b1"][0])
    slab = slab.at[_B2_R, 0:4].set(params["b2"][0])
    slab = slab.at[_B3_R, 0:2].set(params["b3"][0])
    slab = slab.at[_BL_R, 0:4].set(params["bl"][0])
    slab = slab.at[_ADJ_R:_ADJ_R + n, 0:n].set(adj)
    return slab


# ---------------------------------------------------------------------------
# Forward: one fused Pallas kernel, 2 operands, grid over the batch.
# ---------------------------------------------------------------------------
def gcn_net_forward(x, packed):
    """x: [B, N, 34] (or [N, 34]); packed: slab from pack_params.

    Returns (out [B, N, 4], x3 [B, N, 2]) — or unbatched if x was 2-D.
    """
    squeeze = (x.ndim == 2)
    if squeeze:
        x = x[None]
    b, n, f = x.shape
    if f < _F_PAD:                       # sublane-pad features once (zeros)
        x = jnp.pad(x, ((0, 0), (0, 0), (0, _F_PAD - f)))

    out, x3 = pl.pallas_call(
        _gcn_net_kernel,
        out_shape=(jax.ShapeDtypeStruct((b, n, 4), jnp.float32),
                   jax.ShapeDtypeStruct((b, n, 2), jnp.float32)),
        grid=(b,),
        in_specs=[
            pl.BlockSpec((None, n, _F_PAD), lambda i: (i, 0, 0)),
            pl.BlockSpec(packed.shape, lambda i: (0, 0)),  # constant block ->
        ],                                                 # slab DMA'd once/call
        out_specs=(
            pl.BlockSpec((None, n, 4), lambda i: (i, 0, 0)),
            pl.BlockSpec((None, n, 2), lambda i: (i, 0, 0)),
        ),
        compiler_params=pltpu.CompilerParams(
            dimension_semantics=("parallel",)),
    )(x, packed)

    if squeeze:
        return out[0], x3[0]
    return out, x3


# ---------------------------------------------------------------------------
# Pure-JAX reference and a deterministic example graph.
# ---------------------------------------------------------------------------
def _reference_forward(adj, x, params):
    h = jnp.maximum(adj @ (x @ params["w1"]) + params["b1"], 0.0)
    h = jnp.maximum(adj @ (h @ params["w2"]) + params["b2"], 0.0)
    x3 = jnp.maximum(adj @ (h @ params["w3"]) + params["b3"], 0.0)
    out = x3 @ params["wl"] + params["bl"]
    return out, x3


def _build_example_graph(num_nodes):
    """Deterministic small undirected graph: ring + a few chords."""
    edges = []
    for i in range(num_nodes):
        j = (i + 1) % num_nodes
        edges.append((i, j))
        edges.append((j, i))
    for i in range(0, num_nodes, 4):
        j = (i + 5) % num_nodes
        edges.append((i, j))
        edges.append((j, i))
    return jnp.array(edges, dtype=jnp.int32).T      # [2, E] = (source, target)


if __name__ == "__main__":
    key = jax.random.PRNGKey(0)
    k_x, k_p = jax.random.split(key)

    num_nodes, batch = 16, 4
    edge_index = _build_example_graph(num_nodes)               # [2, E] int32
    xb = jax.random.normal(k_x, (batch, num_nodes, 34), jnp.float32)

    params = init_params(k_p)

    # Hoisted per-(graph, model) preprocessing (NOT in the forward path).
    adj = normalized_adjacency(edge_index, num_nodes)          # [N, N] f32
    packed = pack_params(params, adj)                          # [472, 128] f32

    fwd = jax.jit(gcn_net_forward)
    out, x3 = fwd(xb, packed)
    jax.block_until_ready((out, x3))

    assert out.shape == (batch, num_nodes, 4) and out.dtype == jnp.float32
    assert x3.shape == (batch, num_nodes, 2) and x3.dtype == jnp.float32

    ref_out, ref_x3 = jax.vmap(lambda xx: _reference_forward(adj, xx, params))(xb)
    assert jnp.allclose(out, ref_out, atol=2e-4, rtol=2e-4)
    assert jnp.allclose(x3, ref_x3, atol=2e-4, rtol=2e-4)

    # Unbatched convenience path (B=1 grid) still works.
    o1, x31 = fwd(xb[0], packed)
    jax.block_until_ready((o1, x31))
    assert jnp.allclose(o1, ref_out[0], atol=2e-4, rtol=2e-4)
    assert jnp.allclose(x31, ref_x3[0], atol=2e-4, rtol=2e-4)

    print("KERNEL_OK")
</pallas_src>

<mosaic_0001>
module attributes {stable_mosaic.version = 11 : i64} {
  func.func @_gcn_net_kernel(%arg0: i32, %arg1: memref<1x16x40xf32, #tpu.memory_space<vmem>>, %arg2: memref<472x128xf32, #tpu.memory_space<vmem>>, %arg3: memref<1x16x4xf32, #tpu.memory_space<vmem>>, %arg4: memref<1x16x2xf32, #tpu.memory_space<vmem>>) attributes {dimension_semantics = [#tpu.dimension_semantics<parallel>], iteration_bounds = array<i64: 4>, scalar_prefetch = 0 : i64, scratch_operands = 0 : i64, tpu.core_type = #tpu.core_type<tc>, window_params = [{transform_indices = @transform_0, window_bounds = array<i64: 1, 16, 40>}, {pipeline_mode = #tpu.pipeline_mode<synchronous>, transform_indices = @transform_1, window_bounds = array<i64: 472, 128>}, {transform_indices = @transform_2, window_bounds = array<i64: 1, 16, 4>}, {transform_indices = @transform_3, window_bounds = array<i64: 1, 16, 2>}]} {
    %c456 = arith.constant 456 : index
    %c0 = arith.constant 0 : index
    %0 = vector.load %arg2[%c456, %c0] : memref<472x128xf32, #tpu.memory_space<vmem>>, vector<16x16xf32>
    %c424 = arith.constant 424 : index
    %c0_0 = arith.constant 0 : index
    %1 = vector.load %arg2[%c424, %c0_0] : memref<472x128xf32, #tpu.memory_space<vmem>>, vector<1x128xf32>
    %c432 = arith.constant 432 : index
    %c0_1 = arith.constant 0 : index
    %2 = vector.load %arg2[%c432, %c0_1] : memref<472x128xf32, #tpu.memory_space<vmem>>, vector<1x128xf32>
    %c440 = arith.constant 440 : index
    %c0_2 = arith.constant 0 : index
    %3 = vector.load %arg2[%c440, %c0_2] : memref<472x128xf32, #tpu.memory_space<vmem>>, vector<1x128xf32>
    %c448 = arith.constant 448 : index
    %c0_3 = arith.constant 0 : index
    %4 = vector.load %arg2[%c448, %c0_3] : memref<472x128xf32, #tpu.memory_space<vmem>>, vector<1x128xf32>
    %c0_4 = arith.constant 0 : index
    %c0_5 = arith.constant 0 : index
    %c0_6 = arith.constant 0 : index
    %5 = vector.load %arg1[%c0_4, %c0_5, %c0_6] : memref<1x16x40xf32, #tpu.memory_space<vmem>>, vector<1x16x40xf32>
    %6 = vector.shape_cast %5 : vector<1x16x40xf32> to vector<16x40xf32>
    %c0_7 = arith.constant 0 : index
    %c0_8 = arith.constant 0 : index
    %7 = vector.load %arg2[%c0_7, %c0_8] : memref<472x128xf32, #tpu.memory_space<vmem>>, vector<40x128xf32>
    %cst = arith.constant dense<0.000000e+00> : vector<16x128xf32>
    %8 = tpu.matmul %6, %7, %cst {dimension_numbers = #tpu.dot_dimension_numbers<[1], [0], [0], [1], [0, 0, 1, 1], [], []>} : vector<16x40xf32>, vector<40x128xf32>, vector<16x128xf32> -> vector<16x128xf32>
    %cst_9 = arith.constant dense<0.000000e+00> : vector<16x128xf32>
    %9 = tpu.matmul %0, %8, %cst_9 {dimension_numbers = #tpu.dot_dimension_numbers<[1], [0], [0], [1], [0, 0, 1, 1], [], []>} : vector<16x16xf32>, vector<16x128xf32>, vector<16x128xf32> -> vector<16x128xf32>
    %10 = vector.broadcast %1 : vector<1x128xf32> to vector<16x128xf32>
    %11 = arith.addf %9, %10 : vector<16x128xf32>
    %cst_10 = arith.constant 0.000000e+00 : f32
    %12 = vector.broadcast %cst_10 : f32 to vector<16x128xf32>
    %13 = arith.maximumf %11, %12 : vector<16x128xf32>
    %c40 = arith.constant 40 : index
    %c0_11 = arith.constant 0 : index
    %14 = vector.load %arg2[%c40, %c0_11] : memref<472x128xf32, #tpu.memory_space<vmem>>, vector<8x128xf32>
    %15 = vector.extract_strided_slice %13 {offsets = [0, 0], sizes = [16, 1], strides = [1, 1]} : vector<16x128xf32> to vector<16x1xf32>
    %16 = vector.extract_strided_slice %14 {offsets = [0, 0], sizes = [1, 128], strides = [1, 1]} : vector<8x128xf32> to vector<1x128xf32>
    %17 = vector.broadcast %15 : vector<16x1xf32> to vector<16x128xf32>
    %18 = vector.broadcast %16 : vector<1x128xf32> to vector<16x128xf32>
    %19 = arith.mulf %17, %18 : vector<16x128xf32>
    %20 = vector.extract_strided_slice %13 {offsets = [0, 1], sizes = [16, 1], strides = [1, 1]} : vector<16x128xf32> to vector<16x1xf32>
    %21 = vector.extract_strided_slice %14 {offsets = [1, 0], sizes = [1, 128], strides = [1, 1]} : vector<8x128xf32> to vector<1x128xf32>
    %22 = vector.broadcast %20 : vector<16x1xf32> to vector<16x128xf32>
    %23 = vector.broadcast %21 : vector<1x128xf32> to vector<16x128xf32>
    %24 = arith.mulf %22, %23 : vector<16x128xf32>
    %25 = vector.extract_strided_slice %13 {offsets = [0, 2], sizes = [16, 1], strides = [1, 1]} : vector<16x128xf32> to vector<16x1xf32>
    %26 = vector.extract_strided_slice %14 {offsets = [2, 0], sizes = [1, 128], strides = [1, 1]} : vector<8x128xf32> to vector<1x128xf32>
    %27 = vector.broadcast %25 : vector<16x1xf32> to vector<16x128xf32>
    %28 = vector.broadcast %26 : vector<1x128xf32> to vector<16x128xf32>
    %29 = arith.mulf %27, %28 : vector<16x128xf32>
    %30 = vector.extract_strided_slice %13 {offsets = [0, 3], sizes = [16, 1], strides = [1, 1]} : vector<16x128xf32> to vector<16x1xf32>
    %31 = vector.extract_strided_slice %14 {offsets = [3, 0], sizes = [1, 128], strides = [1, 1]} : vector<8x128xf32> to vector<1x128xf32>
    %32 = vector.broadcast %30 : vector<16x1xf32> to vector<16x128xf32>
    %33 = vector.broadcast %31 : vector<1x128xf32> to vector<16x128xf32>
    %34 = arith.mulf %32, %33 : vector<16x128xf32>
    %35 = arith.addf %19, %24 : vector<16x128xf32>
    %36 = arith.addf %29, %34 : vector<16x128xf32>
    %37 = arith.addf %35, %36 : vector<16x128xf32>
    %cst_12 = arith.constant dense<0.000000e+00> : vector<16x128xf32>
    %38 = tpu.matmul %0, %37, %cst_12 {dimension_numbers = #tpu.dot_dimension_numbers<[1], [0], [0], [1], [0, 0, 1, 1], [], []>} : vector<16x16xf32>, vector<16x128xf32>, vector<16x128xf32> -> vector<16x128xf32>
    %39 = vector.broadcast %2 : vector<1x128xf32> to vector<16x128xf32>
    %40 = arith.addf %38, %39 : vector<16x128xf32>
    %cst_13 = arith.constant 0.000000e+00 : f32
    %41 = vector.broadcast %cst_13 : f32 to vector<16x128xf32>
    %42 = arith.maximumf %40, %41 : vector<16x128xf32>
    %c168 = arith.constant 168 : index
    %c0_14 = arith.constant 0 : index
    %43 = vector.load %arg2[%c168, %c0_14] : memref<472x128xf32, #tpu.memory_space<vmem>>, vector<8x128xf32>
    %44 = vector.extract_strided_slice %42 {offsets = [0, 0], sizes = [16, 1], strides = [1, 1]} : vector<16x128xf32> to vector<16x1xf32>
    %45 = vector.extract_strided_slice %43 {offsets = [0, 0], sizes = [1, 128], strides = [1, 1]} : vector<8x128xf32> to vector<1x128xf32>
    %46 = vector.broadcast %44 : vector<16x1xf32> to vector<16x128xf32>
    %47 = vector.broadcast %45 : vector<1x128xf32> to vector<16x128xf32>
    %48 = arith.mulf %46, %47 : vector<16x128xf32>
    %49 = vector.extract_strided_slice %42 {offsets = [0, 1], sizes = [16, 1], strides = [1, 1]} : vector<16x128xf32> to vector<16x1xf32>
    %50 = vector.extract_strided_slice %43 {offsets = [1, 0], sizes = [1, 128], strides = [1, 1]} : vector<8x128xf32> to vector<1x128xf32>
    %51 = vector.broadcast %49 : vector<16x1xf32> to vector<16x128xf32>
    %52 = vector.broadcast %50 : vector<1x128xf32> to vector<16x128xf32>
    %53 = arith.mulf %51, %52 : vector<16x128xf32>
    %54 = vector.extract_strided_slice %42 {offsets = [0, 2], sizes = [16, 1], strides = [1, 1]} : vector<16x128xf32> to vector<16x1xf32>
    %55 = vector.extract_strided_slice %43 {offsets = [2, 0], sizes = [1, 128], strides = [1, 1]} : vector<8x128xf32> to vector<1x128xf32>
    %56 = vector.broadcast %54 : vector<16x1xf32> to vector<16x128xf32>
    %57 = vector.broadcast %55 : vector<1x128xf32> to vector<16x128xf32>
    %58 = arith.mulf %56, %57 : vector<16x128xf32>
    %59 = vector.extract_strided_slice %42 {offsets = [0, 3], sizes = [16, 1], strides = [1, 1]} : vector<16x128xf32> to vector<16x1xf32>
    %60 = vector.extract_strided_slice %43 {offsets = [3, 0], sizes = [1, 128], strides = [1, 1]} : vector<8x128xf32> to vector<1x128xf32>
    %61 = vector.broadcast %59 : vector<16x1xf32> to vector<16x128xf32>
    %62 = vector.broadcast %60 : vector<1x128xf32> to vector<16x128xf32>
    %63 = arith.mulf %61, %62 : vector<16x128xf32>
    %64 = arith.addf %48, %53 : vector<16x128xf32>
    %65 = arith.addf %58, %63 : vector<16x128xf32>
    %66 = arith.addf %64, %65 : vector<16x128xf32>
    %cst_15 = arith.constant dense<0.000000e+00> : vector<16x128xf32>
    %67 = tpu.matmul %0, %66, %cst_15 {dimension_numbers = #tpu.dot_dimension_numbers<[1], [0], [0], [1], [0, 0, 1, 1], [], []>} : vector<16x16xf32>, vector<16x128xf32>, vector<16x128xf32> -> vector<16x128xf32>
    %68 = vector.broadcast %3 : vector<1x128xf32> to vector<16x128xf32>
    %69 = arith.addf %67, %68 : vector<16x128xf32>
    %cst_16 = arith.constant 0.000000e+00 : f32
    %70 = vector.broadcast %cst_16 : f32 to vector<16x128xf32>
    %71 = arith.maximumf %69, %70 : vector<16x128xf32>
    %c296 = arith.constant 296 : index
    %c0_17 = arith.constant 0 : index
    %72 = vector.load %arg2[%c296, %c0_17] : memref<472x128xf32, #tpu.memory_space<vmem>>, vector<8x128xf32>
    %73 = vector.extract_strided_slice %71 {offsets = [0, 0], sizes = [16, 1], strides = [1, 1]} : vector<16x128xf32> to vector<16x1xf32>
    %74 = vector.extract_strided_slice %72 {offsets = [0, 0], sizes = [1, 128], strides = [1, 1]} : vector<8x128xf32> to vector<1x128xf32>
    %75 = vector.broadcast %73 : vector<16x1xf32> to vector<16x128xf32>
    %76 = vector.broadcast %74 : vector<1x128xf32> to vector<16x128xf32>
    %77 = arith.mulf %75, %76 : vector<16x128xf32>
    %78 = vector.extract_strided_slice %71 {offsets = [0, 1], sizes = [16, 1], strides = [1, 1]} : vector<16x128xf32> to vector<16x1xf32>
    %79 = vector.extract_strided_slice %72 {offsets = [1, 0], sizes = [1, 128], strides = [1, 1]} : vector<8x128xf32> to vector<1x128xf32>
    %80 = vector.broadcast %78 : vector<16x1xf32> to vector<16x128xf32>
    %81 = vector.broadcast %79 : vector<1x128xf32> to vector<16x128xf32>
    %82 = arith.mulf %80, %81 : vector<16x128xf32>
    %83 = arith.addf %77, %82 : vector<16x128xf32>
    %84 = vector.broadcast %4 : vector<1x128xf32> to vector<16x128xf32>
    %85 = arith.addf %83, %84 : vector<16x128xf32>
    %86 = vector.extract_strided_slice %85 {offsets = [0, 0], sizes = [16, 4], strides = [1, 1]} : vector<16x128xf32> to vector<16x4xf32>
    %c0_18 = arith.constant 0 : index
    %c0_19 = arith.constant 0 : index
    %c0_20 = arith.constant 0 : index
    %87 = vector.load %arg3[%c0_18, %c0_19, %c0_20] : memref<1x16x4xf32, #tpu.memory_space<vmem>>, vector<1x16x4xf32>
    %88 = vector.shape_cast %87 : vector<1x16x4xf32> to vector<16x4xf32>
    %89 = vector.shape_cast %86 : vector<16x4xf32> to vector<1x16x4xf32>
    tpu.vector_store %arg3[%c0_18, %c0_19, %c0_20], %89 {strides = array<i32>} : memref<1x16x4xf32, #tpu.memory_space<vmem>>, vector<1x16x4xf32>,
    %90 = vector.extract_strided_slice %71 {offsets = [0, 0], sizes = [16, 2], strides = [1, 1]} : vector<16x128xf32> to vector<16x2xf32>
    %c0_21 = arith.constant 0 : index
    %c0_22 = arith.constant 0 : index
    %c0_23 = arith.constant 0 : index
    %91 = vector.load %arg4[%c0_21, %c0_22, %c0_23] : memref<1x16x2xf32, #tpu.memory_space<vmem>>, vector<1x16x2xf32>
    %92 = vector.shape_cast %91 : vector<1x16x2xf32> to vector<16x2xf32>
    %93 = vector.shape_cast %90 : vector<16x2xf32> to vector<1x16x2xf32>
    tpu.vector_store %arg4[%c0_21, %c0_22, %c0_23], %93 {strides = array<i32>} : memref<1x16x2xf32, #tpu.memory_space<vmem>>, vector<1x16x2xf32>,
    return
  }
  func.func @transform_0(%arg0: i32) -> (i32, i32, i32) {
    %c0_i32 = arith.constant 0 : i32
    %c0_i32_0 = arith.constant 0 : i32
    %c0_i32_1 = arith.constant 0 : i32
    return %arg0, %c0_i32, %c0_i32_0 : i32, i32, i32
  }
  func.func @transform_1(%arg0: i32) -> (i32, i32) {
    %c0_i32 = arith.constant 0 : i32
    %c0_i32_0 = arith.constant 0 : i32
    %c0_i32_1 = arith.constant 0 : i32
    return %c0_i32, %c0_i32_0 : i32, i32
  }
  func.func @transform_2(%arg0: i32) -> (i32, i32, i32) {
    %c0_i32 = arith.constant 0 : i32
    %c0_i32_0 = arith.constant 0 : i32
    %c0_i32_1 = arith.constant 0 : i32
    return %arg0, %c0_i32, %c0_i32_0 : i32, i32, i32
  }
  func.func @transform_3(%arg0: i32) -> (i32, i32, i32) {
    %c0_i32 = arith.constant 0 : i32
    %c0_i32_0 = arith.constant 0 : i32
    %c0_i32_1 = arith.constant 0 : i32
    return %arg0, %c0_i32, %c0_i32_0 : i32, i32, i32
  }
}

</mosaic_0001>

<bundles_post_ra>
// kernel: gcn_net_forward.1
= control target key start
LH: loop header
LB: loop body
LE: loop exit
PB: predicated region body
PF: predicated region fallthrough
CT: control target
= control target key end

     0   :  { %9 = vsyncpa [#allocation3], 0  ;;  %s1011_s12 = smov 0   ;;  %s1111_s0 = inlined_call_operand.vmem [shape: f32[4,16,40], index: 0, kind: input, shape index: {}]   ;;  %s1112_s1 = inlined_call_operand.hbm [shape: f32[472,128], index: 1, kind: input, shape index: {}]   ;;  %s1113_s2 = inlined_call_operand.vmem [shape: f32[4,16,4], index: 2, kind: output, shape index: {0}]   ;;  %s1114_s3 = inlined_call_operand.vmem [shape: f32[4,16,2], index: 3, kind: output, shape index: {1}]  }
   0x1 LB: > { %s819_s13 = sadd.s32 4294967295, %s982_s12   ;;  %p821_p0 = scmp.ge.s32.totalorder %s982_s12, 1  ;;  %s982_s12 = sphi %s1011_s12, %s15_s12  }
   0x2   : > { %p119_p1 = scmp.lt.s32.totalorder %s982_s12, 5  ;;  %s984_s14 = smov [#allocation2]  }
   0x3   : > { %s131_s15 = sshll.u32 %s984_s14, 4  ;;  %p910_p3 = scmp.eq.s32.totalorder %s819_s13, 0  ;;  %s132_s15 = int_to_ptr.vmem [resolvable:$true] %s131_s15 }
   0x4   : > { %p1019_p2 = pnand %p821_p0, %p119_p1  ;;  %s957_s17 = scalar_lea.vmem %s132_s15, 7552 }
   0x5   : > { %p958_p7 = scmp.ne.s32.totalorder %s132_s15, %s957_s17  ;;  %p965_p10 = scmp.lt.s32.totalorder %s132_s15, %s132_s15 }
   0x6   : > { %p906_p4 = pneg %p1019_p2  ;;  %p966_p11 = scmp.lt.s32.totalorder %s957_s17, %s957_s17 }
   0x8   : > { %p907_p5 = pnand %p910_p3, %p906_p4  ;;  %p967_p12 = por %p966_p11, %p965_p10 }
   0xa   : > { %p948_p6 = pneg %p907_p5 }
   0xc   : > { %p960_p8 = pnand %p958_p7, %p948_p6 }
   0xe   : > { %p961_p9 = pneg %p960_p8 }
  0x10   : > { %p968_p13 = pnand %p967_p12, %p961_p9 }
  0x12   : > { %971 = shalt.err (!%p968_p13)
}
  0x13   : > { %s985_s18 = smov 128   ;;  %s986_s19 = smov 8  }
  0x14   : > { %909 = dma.hbm_to_vmem [thread:$0]  (!%p907_p5), %s1112_s1, 7552, %s132_s15, [#allocation3], %s985_s18, %s985_s18, %s986_s19  }
  0x15   : > { %155 = sbr.rel (%p1019_p2) target bundleno = 1268 (0x4f4), region = 28 }
  0x1a   : > { %977 = dma.done.wait (%p910_p3), [#allocation3], 7552  }
  0x1b   : > { %979 = vsyncadd (%p910_p3), [#allocation3], 4294959744  ;;  %p184_p0 = scmp.lt.s32.totalorder %s819_s13, 3  ;;  %vm212_vm0 = vcmask 326656   ;;  %v211_v0 = vld [vmem:[#allocation2 + $0x20] sm:$0xff]  ;;  %v210_v1 = vld [vmem:[#allocation2 + $0x18] sm:$0xff]  ;;  %v393_v22 = vlaneseq }
  0x1c   : > { %868 = vmatprep.subr.mxu0 %v211_v0  ;;  %v209_v3 = vld [vmem:[#allocation2 + $0x10] sm:$0xff]  ;;  %v208_v4 = vld [vmem:[#allocation2 + $0x8] sm:$0xff]  ;;  %v207_v5 = vld [vmem:[#allocation2] sm:$0xff]  ;;  %vm298_vm1 = vcmask 130048   ;;  %v987_v11 = vmov 2   ;;  %v988_v12 = vmov 0  }
  0x1d   : > { %s1117_s13 = smov (!%p184_p0, %s819_s13), 3  ;;  %869 = vmatpush3.msra.mxu0 %v211_v0  ;;  %v1041_v7 = vld [vmem:[#allocation2 + $0x1c8] sm:$0xff]  ;;  %v1045_v10 = vld [vmem:[#allocation2 + $0x1d0] sm:$0xff]  ;;  %929 = vset.pattern.permute.xlu1 %v987_v11  ;;  %v989_v19 = vmov 3   ;;  %v990_v20 = vmov 1   ;;  %v1060_v23 = vshrl.u32 %v393_v22, 7 }
  0x1e   : > { %s1033_s22 = sshll.u32 %s1117_s13, 4  ;;  %870 = vmatprep.subr.mxu0 %v210_v1  ;;  %885 = vmatprep.mubr.msk.f32.mxu1 %vm298_vm1, %v1041_v7  ;;  %v834_v13 = vld [vmem:[#allocation2 + $0x1a8] ss:$0 sm:$0xff]  ;;  %v837_v55 = vld [vmem:[#allocation2 + $0x1b0] ss:$0 sm:$0xff]  ;;  %vm716_vm2 = vcmask 15360  }
  0x1f   : > { %s188_s25 = scalar_lea.vmem %s1111_s0, %s1033_s22  ;;  %871 = vmatpush3.msra.mxu0 %v210_v1  ;;  %927 = vset.pattern.permute.xlu0 %v988_v12  ;;  %v423_v24 = vsub.s32 2, %v1060_v23  ;;  %v1064_v25 = vsub.s32 0, %v1060_v23  ;;  %v437_v26 = vsub.s32 3, %v1060_v23  ;;  %v1068_v27 = vsub.s32 1, %v1060_v23  ;;  %v382_v28 = vld [vmem:[#allocation2 + $0x28] sm:$0xff]  ;;  %s198_s28 = scalar_lea.vmem %s1114_s3, %s1033_s22 }
  0x20   : > { %v205_v2 = vld [vmem:[%s188_s25] sm:$0xff]  ;;  %872 = vmatprep.subr.mxu0 %v209_v3  ;;  %v206_v6 = vld [vmem:[%s188_s25 + $0x8] sm:$0xff]  ;;  %s193_s4 = scalar_lea.vmem %s1113_s2, %s1033_s22  ;;  %vm713_vm3 = vcmask 31744  }
  0x21   : > { %878 = vmatprep.mubr.msk.f32.mxu0 %vm212_vm0, %v205_v2  ;;  %873 = vmatpush3.msra.mxu0 %v209_v3  ;;  %v424_v31 = vrot.slane %v382_v28, %v423_v24  ;;  %v396_v32 = vrot.slane %v382_v28, %v1064_v25  ;;  %v438_v33 = vrot.slane %v382_v28, %v437_v26  ;;  %v528_v63 = vld [vmem:[#allocation2 + $0xa8] sm:$0xff] }
  0x22   : > { %874 = vmatprep.subr.mxu0 %v208_v4  ;;  %v410_v34 = vrot.slane %v382_v28, %v1068_v27  ;;  %v556_v0 = vrot.slane %v528_v63, %v1068_v27  ;;  %v570_v2 = vrot.slane %v528_v63, %v423_v24  ;;  %v542_v3 = vrot.slane %v528_v63, %v1064_v25 }
  0x23   : > { %875 = vmatpush3.msra.mxu0 %v208_v4  ;;  %v584_v4 = vrot.slane %v528_v63, %v437_v26 }
  0x24   : > { %876 = vmatprep.subr.mxu0 %v207_v5 }
  0x25   : > { %877 = vmatpush3.msra.mxu0 %v207_v5 }
  0x26   : > { %879 = vmatmul.mubr.msk.f32.vlgmr.msra.gmra.mxu0 %vm212_vm0, %v206_v6 }
  0xe6   : > { %v880_v8 = vpop.f32.mrf.mxu0 }
  0xe7   : > { %881 = vmatprep.subr.mxu1 %v880_v8 }
  0xe8   : > { %v285_v9 = vpop.f32.mrf.mxu0  ;;  %882 = vmatpush3.msra.mxu1 %v880_v8 }
  0xe9   : > { %883 = vmatprep.subr.mxu1 %v285_v9 }
  0xea   : > { %884 = vmatpush3.msra.mxu1 %v285_v9 }
  0xeb   : > { %886 = vmatmul.mubr.msk.f32.vlgmr.msra.gmra.mxu1 %vm298_vm1, %v1045_v10 }
  0xec   : > { %892 = vmatprep.mubr.msk.f32.mxu1 %vm298_vm1, %v1041_v7 }
 0x1ab   : > { %v887_v14 = vpop.f32.mrf.mxu1 }
 0x1ac   : > { %v377_v15 = vadd.f32 %v887_v14, %v834_v13 }
 0x1ad   : > { %v371_v17 = vpop.f32.mrf.mxu1 }
 0x1ae   : > { %v381_v16 = vmax.f32 %v377_v15, 0.0  ;;  %v372_v18 = vadd.f32 %v834_v13, %v371_v17 }
 0x1b0   : > { %418 = vperm.xlu1 %929, %v381_v16   ;;  %390 = vperm.xlu0 %927, %v381_v16   ;;  %v380_v21 = vmax.f32 %v372_v18, 0.0 }
 0x1b4   : > { %930 = vset.pattern.permute.xlu1 %v989_v19  ;;  %928 = vset.pattern.permute.xlu0 %v990_v20 }
 0x1b5   : > { %432 = vperm.xlu1 %930, %v381_v16   ;;  %404 = vperm.xlu0 %928, %v381_v16  }
 0x1b9   : > { %931 = vset.pattern.permute.xlu1 %v988_v12  ;;  %400 = vperm.xlu0 %928, %v380_v21  }
 0x1ba   : > { %385 = vperm.xlu1 %931, %v380_v21  }
 0x1bd   : > { %933 = vset.pattern.permute.xlu0 %v989_v19 }
 0x1be   : > { %428 = vperm.xlu0 %933, %v380_v21   ;;  %932 = vset.pattern.permute.xlu1 %v987_v11 }
 0x1bf   : > { %414 = vperm.xlu1 %932, %v380_v21  }
 0x1c2   : > { %936 = vset.pattern.permute.xlu0 %v987_v11 }
 0x1c3   : > { %934 = vset.pattern.permute.xlu1 %v988_v12 }
 0x22b   : > { %v419_v29 = vpop.permute.xlu1 %418  ;;  %v391_v30 = vpop.permute.xlu0 %390 }
 0x22c   : > { %v426_v37 = vmul.f32 %v424_v31, %v419_v29  ;;  %v398_v38 = vmul.f32 %v396_v32, %v391_v30  ;;  %v840_v29 = vld [vmem:[#allocation2 + $0x1b8] ss:$0 sm:$0xff] }
 0x230   : > { %v433_v35 = vpop.permute.xlu1 %432  ;;  %v405_v36 = vpop.permute.xlu0 %404 }
 0x231   : > { %v440_v39 = vmul.f32 %v438_v33, %v433_v35  ;;  %v412_v40 = vmul.f32 %v410_v34, %v405_v36  ;;  %v674_v36 = vld [vmem:[#allocation2 + $0x128] sm:$0xff] }
 0x233   : > { %v444_v41 = vadd.f32 %v440_v39, %v426_v37  ;;  %v442_v42 = vadd.f32 %v412_v40, %v398_v38  ;;  %v702_v38 = vrot.slane %v674_v36, %v1068_v27  ;;  %v688_v39 = vrot.slane %v674_v36, %v1064_v25 }
 0x234   : > { %v401_v43 = vpop.permute.xlu0 %400 }
 0x235   : > { %v386_v44 = vpop.permute.xlu1 %385  ;;  %v446_v45 = vadd.f32 %v444_v41, %v442_v42  ;;  %v411_v46 = vmul.f32 %v410_v34, %v401_v43  ;;  %v843_v43 = vld [vmem:[#allocation2 + $0x1c0] ss:$0 sm:$0xff] }
 0x236   : > { %v397_v47 = vmul.f32 %v396_v32, %v386_v44 }
 0x237   : > { %888 = vmatprep.subr.mxu1 %v446_v45 }
 0x238   : > { %889 = vmatpush3.msra.mxu1 %v446_v45  ;;  %v441_v52 = vadd.f32 %v411_v46, %v397_v47 }
 0x239   : > { %v429_v48 = vpop.permute.xlu0 %428 }
 0x23a   : > { %v439_v49 = vmul.f32 %v438_v33, %v429_v48  ;;  %v415_v50 = vpop.permute.xlu1 %414 }
 0x23b   : > { %v425_v51 = vmul.f32 %v424_v31, %v415_v50 }
 0x23d   : > { %v443_v53 = vadd.f32 %v439_v49, %v425_v51 }
 0x23f   : > { %v445_v54 = vadd.f32 %v443_v53, %v441_v52 }
 0x241   : > { %890 = vmatprep.subr.mxu1 %v445_v54 }
 0x242   : > { %891 = vmatpush3.msra.mxu1 %v445_v54 }
 0x243   : > { %893 = vmatmul.mubr.msk.f32.vlgmr.msra.gmra.mxu1 %vm298_vm1, %v1045_v10 }
 0x244   : > { %899 = vmatprep.mubr.msk.f32.mxu1 %vm298_vm1, %v1041_v7 }
 0x303   : > { %v894_v56 = vpop.f32.mrf.mxu1 }
 0x304   : > { %v523_v57 = vadd.f32 %v894_v56, %v837_v55 }
 0x305   : > { %v517_v58 = vpop.f32.mrf.mxu1 }
 0x306   : > { %v527_v59 = vmax.f32 %v523_v57, 0.0  ;;  %v518_v60 = vadd.f32 %v837_v55, %v517_v58 }
 0x308   : > { %564 = vperm.xlu0 %936, %v527_v59   ;;  %536 = vperm.xlu1 %934, %v527_v59   ;;  %v526_v61 = vmax.f32 %v518_v60, 0.0 }
 0x30c   : > { %939 = vset.pattern.permute.xlu0 %v990_v20  ;;  %935 = vset.pattern.permute.xlu1 %v990_v20 }
 0x30d   : > { %550 = vperm.xlu1 %935, %v527_v59   ;;  %546 = vperm.xlu0 %939, %v526_v61  }
 0x311   : > { %937 = vset.pattern.permute.xlu1 %v989_v19  ;;  %943 = vset.pattern.permute.xlu0 %v988_v12 }
 0x312   : > { %578 = vperm.xlu1 %937, %v527_v59  }
 0x316   : > { %938 = vset.pattern.permute.xlu1 %v988_v12 }
 0x317   : > { %531 = vperm.xlu1 %938, %v526_v61  }
 0x31b   : > { %940 = vset.pattern.permute.xlu1 %v987_v11 }
 0x31c   : > { %560 = vperm.xlu1 %940, %v526_v61  }
 0x320   : > { %941 = vset.pattern.permute.xlu1 %v989_v19 }
 0x321   : > { %574 = vperm.xlu1 %941, %v526_v61  }
 0x325   : > { %942 = vset.pattern.permute.xlu1 %v988_v12 }
 0x383   : > { %v537_v62 = vpop.permute.xlu1 %536  ;;  %v565_v5 = vpop.permute.xlu0 %564 }
 0x384   : > { %v572_v8 = vmul.f32 %v570_v2, %v565_v5  ;;  %v544_v9 = vmul.f32 %v542_v3, %v537_v62 }
 0x388   : > { %v551_v1 = vpop.permute.xlu1 %550  ;;  %v547_v17 = vpop.permute.xlu0 %546 }
 0x389   : > { %v558_v6 = vmul.f32 %v556_v0, %v551_v1  ;;  %v557_v21 = vmul.f32 %v556_v0, %v547_v17 }
 0x38b   : > { %v588_v12 = vadd.f32 %v558_v6, %v544_v9 }
 0x38d   : > { %v579_v7 = vpop.permute.xlu1 %578 }
 0x38e   : > { %v586_v11 = vmul.f32 %v584_v4, %v579_v7 }
 0x390   : > { %v590_v13 = vadd.f32 %v586_v11, %v572_v8 }
 0x392   : > { %v532_v14 = vpop.permute.xlu1 %531  ;;  %v592_v15 = vadd.f32 %v590_v13, %v588_v12 }
 0x393   : > { %v543_v18 = vmul.f32 %v542_v3, %v532_v14 }
 0x394   : > { %895 = vmatprep.subr.mxu1 %v592_v15 }
 0x395   : > { %896 = vmatpush3.msra.mxu1 %v592_v15  ;;  %v587_v24 = vadd.f32 %v557_v21, %v543_v18 }
 0x397   : > { %v561_v16 = vpop.permute.xlu1 %560 }
 0x398   : > { %v571_v22 = vmul.f32 %v570_v2, %v561_v16 }
 0x39c   : > { %v575_v19 = vpop.permute.xlu1 %574 }
 0x39d   : > { %v585_v23 = vmul.f32 %v584_v4, %v575_v19 }
 0x39f   : > { %v589_v26 = vadd.f32 %v585_v23, %v571_v22 }
 0x3a1   : > { %v591_v28 = vadd.f32 %v589_v26, %v587_v24 }
 0x3a3   : > { %897 = vmatprep.subr.mxu1 %v591_v28 }
 0x3a4   : > { %898 = vmatpush3.msra.mxu1 %v591_v28 }
 0x3a5   : > { %900 = vmatmul.mubr.msk.f32.vlgmr.msra.gmra.mxu1 %vm298_vm1, %v1045_v10 }
 0x465   : > { %v901_v30 = vpop.f32.mrf.mxu1 }
 0x466   : > { %v669_v31 = vadd.f32 %v901_v30, %v840_v29 }
 0x467   : > { %v663_v32 = vpop.f32.mrf.mxu1 }
 0x468   : > { %v673_v33 = vmax.f32 %v669_v31, 0.0  ;;  %v664_v34 = vadd.f32 %v840_v29, %v663_v32 }
 0x46a   : > { %718 = vst.msk [vmem:[%s198_s28 + $0x8] sm:$0xff] %vm716_vm2, %v673_v33  ;;  %v672_v35 = vmax.f32 %v664_v34, 0.0  ;;  %682 = vperm.xlu1 %942, %v673_v33  }
 0x46c   : > { %717 = vst.msk [vmem:[%s198_s28] sm:$0xff] %vm716_vm2, %v672_v35  ;;  %677 = vperm.xlu0 %943, %v672_v35  }
 0x46e   : > { %944 = vset.pattern.permute.xlu1 %v990_v20 }
 0x46f   : > { %692 = vperm.xlu1 %944, %v672_v35  }
 0x470   : > { %945 = vset.pattern.permute.xlu0 %v990_v20 }
 0x471   : > { %696 = vperm.xlu0 %945, %v673_v33  }
 0x4e5   : > { %v683_v10 = vpop.permute.xlu1 %682 }
 0x4e6   : > { %v690_v45 = vmul.f32 %v688_v39, %v683_v10 }
 0x4e7   : > { %v678_v37 = vpop.permute.xlu0 %677 }
 0x4e8   : > { %v689_v41 = vmul.f32 %v688_v39, %v678_v37 }
 0x4ea   : > { %v693_v40 = vpop.permute.xlu1 %692 }
 0x4eb   : > { %v703_v42 = vmul.f32 %v702_v38, %v693_v40 }
 0x4ec   : > { %v697_v44 = vpop.permute.xlu0 %696 }
 0x4ed   : > { %v705_v46 = vadd.f32 %v703_v42, %v689_v41  ;;  %v704_v47 = vmul.f32 %v702_v38, %v697_v44 }
 0x4ef   : > { %v711_v20 = vadd.f32 %v843_v43, %v705_v46  ;;  %v706_v48 = vadd.f32 %v704_v47, %v690_v45 }
 0x4f1   : > { %714 = vst.msk [vmem:[%s193_s4] sm:$0xff] %vm713_vm3, %v711_v20  ;;  %v712_v49 = vadd.f32 %v843_v43, %v706_v48 }
 0x4f3   : > { %715 = vst.msk [vmem:[%s193_s4 + $0x8] sm:$0xff] %vm713_vm3, %v712_v49 }
 0x4f4 PF: > { %s15_s12 = sadd.s32 1, %s982_s12  }
 0x4f5   : > { %p12_p1 = scmp.ge.s32.totalorder %s15_s12, 6  }
 0x4f7   :  { %14 = sbr.rel (!%p12_p1) target bundleno = 1 (0x1), region = 75 }
 0x4fc   :  { %756 = vsyncpa [#allocation3], 1 }
 0x4fd   :  { %758 = vsyncpa [#allocation3 + $0x1], 1 }

</bundles_post_ra>
